<compile_context>
chip_gen: v5e
topology: v5e:2x2
jax: 0.10.0
libtpu: 0.0.40
codegen_flags: <defaults>
</compile_context>

<pallas_src>
import functools

import jax
import jax.numpy as jnp
from jax.experimental import pallas as pl
from jax.experimental.pallas import tpu as pltpu

EPS = 1e-5
LANE = 128
MAX_TM = 512                      # max batch-tile rows
VMEM_BUDGET = 36 * 1024 * 1024    # conservative per-stage working-set budget


def _round_up(n, m):
    return ((n + m - 1) // m) * m


def _vmem_limit(need_bytes):
    # Scoped defaults are only 16/32/32 MiB (v5e/v6e/v7x); set explicitly, but stay
    # below v7x's 64 MiB physical VMEM.
    return int(min(56 * 1024 * 1024, max(32 * 1024 * 1024, need_bytes + 8 * 1024 * 1024)))


def _choose_tm(batch, in_p, h_p, w_itemsize):
    """Batch-tile rows: one tile for small batches; otherwise the largest power-of-two
    multiple of 128 whose per-stage working set fits the VMEM budget."""
    if batch <= 256:
        return _round_up(batch, 16)
    k = max(in_p, h_p)
    resident = 2 * (k * h_p * w_itemsize + 8 * h_p * 4)       # weights + packed params

    def fits(tm):
        per_tile = 2 * (tm * k * 4 + tm * h_p * 4 + 2 * h_p * 4) + tm * h_p * 4
        return resident + per_tile <= VMEM_BUDGET

    tm = 128
    while tm * 2 <= MAX_TM and tm * 2 <= _round_up(batch, 128) and fits(tm * 2):
        tm *= 2
    return tm


# ----------------------------------------------------------------------------------
# Kernels
# ----------------------------------------------------------------------------------
def _linear_stats_kernel(x_ref, w_ref, p_ref, h_ref, stats_ref, *,
                         true_batch, batch_pad, apply_bn_relu):
    """One batch tile of: [optional fused BN-apply + ReLU] -> Linear -> partial stats.

    p_ref rows: 0 = bias of this Linear; 1 = scale, 2 = shift of the preceding BN
    (only read when apply_bn_relu).  stats_ref receives this tile's masked per-column
    [sum, sum_sq] of the Linear output (reduced in the wrapper for the NEXT BN)."""
    i = pl.program_id(0)
    tm = x_ref.shape[0]

    a = x_ref[...]
    if apply_bn_relu:
        # Fused BN apply + ReLU: a single VPU sweep, no (h - mu) intermediate.
        a = jnp.maximum(a.astype(jnp.float32) * p_ref[1:2, :] + p_ref[2:3, :], 0.0)
    if a.dtype != w_ref.dtype:
        a = a.astype(w_ref.dtype)          # bf16 operands when weights prepared in bf16

    h = jnp.dot(a, w_ref[...], preferred_element_type=jnp.float32) + p_ref[0:1, :]
    h_ref[...] = h.astype(h_ref.dtype)

    # Per-tile partial stats for the next BatchNorm (mask batch-padding rows so the
    # wrapper divides by the true batch size).
    if batch_pad > true_batch:
        rows = i * tm + jax.lax.broadcasted_iota(jnp.int32, (tm, 1), 0)
        h = jnp.where(rows < true_batch, h, 0.0)
    stats_ref[0, 0:1, :] = jnp.sum(h, axis=0, keepdims=True)
    stats_ref[0, 1:2, :] = jnp.sum(h * h, axis=0, keepdims=True)


def _bn_relu_rowdot_kernel(h_ref, p_ref, o_ref):
    """One batch tile of: fused BN-apply + ReLU -> fc3 (out_features == 1).

    p_ref rows: 0 = scale, 1 = shift, 2 = fc3 weight row, 3 = fc3 bias (lane 0).
    fc3 is a VPU multiply + XLU lane reduction (avoids a degenerate N=1 MXU pass);
    the (tm, 1) output column writes only 4 B/row of HBM."""
    a = jnp.maximum(h_ref[...].astype(jnp.float32) * p_ref[0:1, :] + p_ref[1:2, :], 0.0)
    y = jnp.sum(a * p_ref[2:3, :], axis=1, keepdims=True) + p_ref[3:4, 0:1]
    o_ref[...] = y.astype(o_ref.dtype)


# ----------------------------------------------------------------------------------
# Stage wrappers (one pallas_call each)
# ----------------------------------------------------------------------------------
def _linear_stats_stage(x, w, pvec, *, true_batch, tm, apply_bn_relu):
    b_pad, k = x.shape
    n = w.shape[1]
    n_tiles = b_pad // tm

    need = (2 * (tm * k * x.dtype.itemsize + tm * n * 4 + 2 * n * 4 + 8 * n * 4)
            + 2 * w.size * w.dtype.itemsize + tm * n * 4)
    cost = pl.CostEstimate(
        flops=2 * b_pad * k * n,
        transcendentals=0,
        bytes_accessed=(x.size * x.dtype.itemsize + w.size * w.dtype.itemsize
                        + pvec.size * 4 + b_pad * n * 4 + n_tiles * 2 * n * 4))

    kern = functools.partial(_linear_stats_kernel, true_batch=true_batch,
                             batch_pad=b_pad, apply_bn_relu=apply_bn_relu)
    h, stats = pl.pallas_call(
        kern,
        grid=(n_tiles,),
        in_specs=[
            pl.BlockSpec((tm, k), lambda i: (i, 0)),        # batch tile of x / h_prev
            pl.BlockSpec((k, n), lambda i: (0, 0)),         # weights: resident across grid
            pl.BlockSpec(pvec.shape, lambda i: (0, 0)),     # packed bias/scale/shift rows
        ],
        out_specs=(
            pl.BlockSpec((tm, n), lambda i: (i, 0)),        # linear output tile
            pl.BlockSpec((1, 2, n), lambda i: (i, 0, 0)),   # per-tile partial BN stats
        ),
        out_shape=(
            jax.ShapeDtypeStruct((b_pad, n), jnp.float32),
            jax.ShapeDtypeStruct((n_tiles, 2, n), jnp.float32),
        ),
        compiler_params=pltpu.CompilerParams(
            dimension_semantics=("parallel",),
            vmem_limit_bytes=_vmem_limit(need)),
        cost_estimate=cost,
    )(x, w, pvec)
    return h, stats


def _bn_relu_rowdot_stage(h, pvec, *, tm):
    b_pad, n = h.shape
    n_tiles = b_pad // tm
    need = 2 * (tm * n * 4 + 8 * n * 4 + tm * 4) + tm * n * 4
    cost = pl.CostEstimate(
        flops=5 * b_pad * n, transcendentals=0,
        bytes_accessed=h.size * 4 + pvec.size * 4 + b_pad * 4)
    return pl.pallas_call(
        _bn_relu_rowdot_kernel,
        grid=(n_tiles,),
        in_specs=[pl.BlockSpec((tm, n), lambda i: (i, 0)),
                  pl.BlockSpec(pvec.shape, lambda i: (0, 0))],
        out_specs=pl.BlockSpec((tm, 1), lambda i: (i, 0)),
        out_shape=jax.ShapeDtypeStruct((b_pad, 1), jnp.float32),
        compiler_params=pltpu.CompilerParams(
            dimension_semantics=("parallel",),
            vmem_limit_bytes=_vmem_limit(need)),
        cost_estimate=cost,
    )(h, pvec)


def _bn_scale_shift(partial_stats, gamma, beta, true_batch):
    """Reduce per-tile [sum, sum_sq] partials -> per-column BN scale/shift (tiny op)."""
    s = jnp.sum(partial_stats, axis=0)                         # (2, H_pad)
    mean = s[0] / true_batch
    var = jnp.maximum(s[1] / true_batch - mean * mean, 0.0)    # biased variance
    scale = gamma * jax.lax.rsqrt(var + EPS)
    shift = beta - mean * scale
    return scale, shift


# ----------------------------------------------------------------------------------
# Parameter preparation (runs once) + forward
# ----------------------------------------------------------------------------------
def prepare_params(params, *, matmul_dtype=jnp.float32):
    """Pad, pack and (optionally) cast parameters ONCE, off the per-call path.

    Zero padding keeps the math exact: padded BN columns get gamma=beta=0 and padded
    weight rows/cols are 0."""
    (w1, b1, g1, be1, w2, b2, g2, be2, w3, b3) = params
    in_dim, hidden = w1.shape
    in_p = _round_up(in_dim, LANE)
    h_p = _round_up(hidden, LANE)
    # NOTE(v6e/v7x): at real sizes where h_p lands on an odd multiple of 128, padding
    # to a multiple of 256 feeds the 2x256x256 MXU better (zero padding stays exact).

    padv = lambda v: jnp.pad(v.reshape(-1).astype(jnp.float32), (0, h_p - hidden))
    return dict(
        in_dim=in_dim, hidden=hidden, in_p=in_p, h_p=h_p,
        matmul_dtype=jnp.dtype(matmul_dtype),
        w1=jnp.pad(w1, ((0, in_p - in_dim), (0, h_p - hidden))).astype(matmul_dtype),
        w2=jnp.pad(w2, ((0, h_p - hidden), (0, h_p - hidden))).astype(matmul_dtype),
        p1=padv(b1).reshape(1, h_p),           # stage-1 packed params (bias row only)
        b2=padv(b2), g1=padv(g1), be1=padv(be1), g2=padv(g2), be2=padv(be2),
        w3=padv(w3),
        b3row=jnp.pad(b3.reshape(-1).astype(jnp.float32), (0, h_p - 1)),
    )


def mlp_forward(x, prepared):
    """x: (B, input_dim) float32 -> (B,) float32 (matches MLPModel.forward)."""
    b, in_dim = x.shape
    assert in_dim == prepared["in_dim"]
    in_p, h_p = prepared["in_p"], prepared["h_p"]
    mdt = prepared["matmul_dtype"]

    tm = _choose_tm(b, in_p, h_p, mdt.itemsize)
    b_pad = _round_up(b, tm)

    xp = x
    if b_pad != b or in_p != in_dim:
        xp = jnp.pad(x, ((0, b_pad - b), (0, in_p - in_dim)))
    if xp.dtype != mdt:
        xp = xp.astype(mdt)        # cast once in the wrapper, not inside the kernel

    # stage 1: fc1 (+ partial stats for bn1)
    h1, st1 = _linear_stats_stage(xp, prepared["w1"], prepared["p1"],
                                  true_batch=b, tm=tm, apply_bn_relu=False)
    scale1, shift1 = _bn_scale_shift(st1, prepared["g1"], prepared["be1"], b)

    # stage 2: bn1 + relu + fc2 (+ partial stats for bn2)
    p2 = jnp.stack([prepared["b2"], scale1, shift1], axis=0)
    h2, st2 = _linear_stats_stage(h1, prepared["w2"], p2,
                                  true_batch=b, tm=tm, apply_bn_relu=True)
    scale2, shift2 = _bn_scale_shift(st2, prepared["g2"], prepared["be2"], b)

    # stage 3: bn2 + relu + fc3, then .view(-1)
    p3 = jnp.stack([scale2, shift2, prepared["w3"], prepared["b3row"]], axis=0)
    y = _bn_relu_rowdot_stage(h2, p3, tm=tm)
    return y[:b, 0]


# ----------------------------------------------------------------------------------
# Test harness
# ----------------------------------------------------------------------------------
def init_params(key, input_dim, hidden_dim):
    """Deterministic synthetic parameters (shapes match the PyTorch module)."""
    ks = jax.random.split(key, 6)
    # Linear weights stored as (in, out) == transpose of PyTorch's (out, in)
    w1 = jax.random.uniform(ks[0], (input_dim, hidden_dim), jnp.float32, -0.5, 0.5)
    b1 = jax.random.uniform(ks[1], (hidden_dim,), jnp.float32, -0.5, 0.5)
    w2 = jax.random.uniform(ks[2], (hidden_dim, hidden_dim), jnp.float32, -0.5, 0.5)
    b2 = jax.random.uniform(ks[3], (hidden_dim,), jnp.float32, -0.5, 0.5)
    w3 = jax.random.uniform(ks[4], (hidden_dim, 1), jnp.float32, -0.5, 0.5)
    b3 = jax.random.uniform(ks[5], (1, 1), jnp.float32, -0.5, 0.5)
    g1 = jnp.ones((hidden_dim,), jnp.float32)
    be1 = jnp.zeros((hidden_dim,), jnp.float32)
    g2 = jnp.ones((hidden_dim,), jnp.float32)
    be2 = jnp.zeros((hidden_dim,), jnp.float32)
    return (w1, b1, g1, be1, w2, b2, g2, be2, w3, b3)


def reference_forward(x, params, matmul_dtype=jnp.float32):
    (w1, b1, g1, be1, w2, b2, g2, be2, w3, b3) = params

    def mm(a, w):
        return jnp.dot(a.astype(matmul_dtype), w.astype(matmul_dtype),
                       preferred_element_type=jnp.float32)

    def bn(h, g, be):
        mu = jnp.mean(h, axis=0, keepdims=True)
        var = jnp.mean((h - mu) ** 2, axis=0, keepdims=True)
        return (h - mu) / jnp.sqrt(var + EPS) * g + be

    h = jnp.maximum(bn(mm(x, w1) + b1, g1, be1), 0.0)
    h = jnp.maximum(bn(mm(h, w2) + b2, g2, be2), 0.0)
    return (h @ w3 + b3).reshape(-1)


if __name__ == "__main__":
    key = jax.random.PRNGKey(0)
    batch, input_dim, hidden_dim = 8, 16, 32

    kx, kp = jax.random.split(key)
    x = jax.random.normal(kx, (batch, input_dim), jnp.float32)
    params = init_params(kp, input_dim, hidden_dim)

    # f32 matmul-operand path (strict check)
    prepared = prepare_params(params)
    y = jax.block_until_ready(mlp_forward(x, prepared))
    y_ref = reference_forward(x, params)
    assert y.shape == (batch,), y.shape
    assert jnp.allclose(y, y_ref, atol=1e-4, rtol=1e-4), (y, y_ref)

    # bf16 matmul-operand path (the production lever on v5e/v6e/v7x), looser tolerance
    prepared_bf16 = prepare_params(params, matmul_dtype=jnp.bfloat16)
    y16 = jax.block_until_ready(mlp_forward(x, prepared_bf16))
    y16_ref = reference_forward(x, params, matmul_dtype=jnp.bfloat16)
    assert y16.shape == (batch,), y16.shape
    assert jnp.allclose(y16, y16_ref, atol=5e-2, rtol=5e-2), (y16, y16_ref)

    print("KERNEL_OK")
</pallas_src>

<mosaic_0001>
module attributes {stable_mosaic.version = 11 : i64} {
  func.func @_linear_stats_kernel(%arg0: i32, %arg1: memref<16x128xf32, #tpu.memory_space<vmem>>, %arg2: memref<128x128xf32, #tpu.memory_space<vmem>>, %arg3: memref<1x128xf32, #tpu.memory_space<vmem>>, %arg4: memref<16x128xf32, #tpu.memory_space<vmem>>, %arg5: memref<1x2x128xf32, #tpu.memory_space<vmem>>) attributes {dimension_semantics = [#tpu.dimension_semantics<parallel>], iteration_bounds = array<i64: 1>, scalar_prefetch = 0 : i64, scratch_operands = 0 : i64, tpu.core_type = #tpu.core_type<tc>, window_params = [{transform_indices = @transform_0, window_bounds = array<i64: 16, 128>}, {pipeline_mode = #tpu.pipeline_mode<synchronous>, transform_indices = @transform_1, window_bounds = array<i64: 128, 128>}, {pipeline_mode = #tpu.pipeline_mode<synchronous>, transform_indices = @transform_2, window_bounds = array<i64: 1, 128>}, {transform_indices = @transform_3, window_bounds = array<i64: 16, 128>}, {transform_indices = @transform_4, window_bounds = array<i64: 1, 2, 128>}]} {
    %c0 = arith.constant 0 : index
    %c0_0 = arith.constant 0 : index
    %0 = vector.load %arg1[%c0, %c0_0] : memref<16x128xf32, #tpu.memory_space<vmem>>, vector<16x128xf32>
    %c0_1 = arith.constant 0 : index
    %c0_2 = arith.constant 0 : index
    %1 = vector.load %arg2[%c0_1, %c0_2] : memref<128x128xf32, #tpu.memory_space<vmem>>, vector<128x128xf32>
    %cst = arith.constant dense<0.000000e+00> : vector<16x128xf32>
    %2 = tpu.matmul %0, %1, %cst {dimension_numbers = #tpu.dot_dimension_numbers<[1], [0], [0], [1], [0, 0, 1, 1], [], []>} : vector<16x128xf32>, vector<128x128xf32>, vector<16x128xf32> -> vector<16x128xf32>
    %c0_3 = arith.constant 0 : index
    %c0_4 = arith.constant 0 : index
    %3 = vector.load %arg3[%c0_3, %c0_4] : memref<1x128xf32, #tpu.memory_space<vmem>>, vector<1x128xf32>
    %4 = vector.broadcast %3 : vector<1x128xf32> to vector<16x128xf32>
    %5 = arith.addf %2, %4 : vector<16x128xf32>
    %c0_5 = arith.constant 0 : index
    %c0_6 = arith.constant 0 : index
    %6 = vector.load %arg4[%c0_5, %c0_6] : memref<16x128xf32, #tpu.memory_space<vmem>>, vector<16x128xf32>
    tpu.vector_store %arg4[%c0_5, %c0_6], %5 {strides = array<i32>} : memref<16x128xf32, #tpu.memory_space<vmem>>, vector<16x128xf32>,
    %c16_i32 = arith.constant 16 : i32
    %7 = arith.muli %arg0, %c16_i32 : i32
    %8 = tpu.iota {dimensions = array<i32: 0>} : vector<16x1xi32>
    %9 = vector.broadcast %7 : i32 to vector<16x1xi32>
    %10 = arith.addi %9, %8 : vector<16x1xi32>
    %c8_i32 = arith.constant 8 : i32
    %11 = vector.broadcast %c8_i32 : i32 to vector<16x1xi32>
    %12 = arith.cmpi slt, %10, %11 : vector<16x1xi32>
    %cst_7 = arith.constant 0.000000e+00 : f32
    %13 = vector.shape_cast %12 : vector<16x1xi1> to vector<16x1xi1>
    %14 = vector.broadcast %13 : vector<16x1xi1> to vector<16x128xi1>
    %15 = vector.broadcast %cst_7 : f32 to vector<16x128xf32>
    %16 = arith.select %14, %5, %15 : vector<16x128xi1>, vector<16x128xf32>
    %cst_8 = arith.constant dense<0.000000e+00> : vector<128xf32>
    %17 = vector.multi_reduction <add>, %16, %cst_8 [0] : vector<16x128xf32> to vector<128xf32>
    %18 = vector.shape_cast %17 : vector<128xf32> to vector<1x128xf32>
    %c0_9 = arith.constant 0 : index
    %c0_10 = arith.constant 0 : index
    %c0_11 = arith.constant 0 : index
    %19 = vector.load %arg5[%c0_9, %c0_10, %c0_11] : memref<1x2x128xf32, #tpu.memory_space<vmem>>, vector<1x1x128xf32>
    %20 = vector.shape_cast %19 : vector<1x1x128xf32> to vector<1x128xf32>
    %21 = vector.shape_cast %18 : vector<1x128xf32> to vector<1x1x128xf32>
    tpu.vector_store %arg5[%c0_9, %c0_10, %c0_11], %21 {strides = array<i32>} : memref<1x2x128xf32, #tpu.memory_space<vmem>>, vector<1x1x128xf32>,
    %22 = arith.mulf %16, %16 : vector<16x128xf32>
    %cst_12 = arith.constant dense<0.000000e+00> : vector<128xf32>
    %23 = vector.multi_reduction <add>, %22, %cst_12 [0] : vector<16x128xf32> to vector<128xf32>
    %24 = vector.shape_cast %23 : vector<128xf32> to vector<1x128xf32>
    %c0_13 = arith.constant 0 : index
    %c1 = arith.constant 1 : index
    %c0_14 = arith.constant 0 : index
    %25 = vector.load %arg5[%c0_13, %c1, %c0_14] : memref<1x2x128xf32, #tpu.memory_space<vmem>>, vector<1x1x128xf32>
    %26 = vector.shape_cast %25 : vector<1x1x128xf32> to vector<1x128xf32>
    %27 = vector.shape_cast %24 : vector<1x128xf32> to vector<1x1x128xf32>
    tpu.vector_store %arg5[%c0_13, %c1, %c0_14], %27 {strides = array<i32>} : memref<1x2x128xf32, #tpu.memory_space<vmem>>, vector<1x1x128xf32>,
    return
  }
  func.func @transform_0(%arg0: i32) -> (i32, i32) {
    %c0_i32 = arith.constant 0 : i32
    %c0_i32_0 = arith.constant 0 : i32
    return %arg0, %c0_i32 : i32, i32
  }
  func.func @transform_1(%arg0: i32) -> (i32, i32) {
    %c0_i32 = arith.constant 0 : i32
    %c0_i32_0 = arith.constant 0 : i32
    %c0_i32_1 = arith.constant 0 : i32
    return %c0_i32, %c0_i32_0 : i32, i32
  }
  func.func @transform_2(%arg0: i32) -> (i32, i32) {
    %c0_i32 = arith.constant 0 : i32
    %c0_i32_0 = arith.constant 0 : i32
    %c0_i32_1 = arith.constant 0 : i32
    return %c0_i32, %c0_i32_0 : i32, i32
  }
  func.func @transform_3(%arg0: i32) -> (i32, i32) {
    %c0_i32 = arith.constant 0 : i32
    %c0_i32_0 = arith.constant 0 : i32
    return %arg0, %c0_i32 : i32, i32
  }
  func.func @transform_4(%arg0: i32) -> (i32, i32, i32) {
    %c0_i32 = arith.constant 0 : i32
    %c0_i32_0 = arith.constant 0 : i32
    %c0_i32_1 = arith.constant 0 : i32
    return %arg0, %c0_i32, %c0_i32_0 : i32, i32, i32
  }
}

</mosaic_0001>

<bundles_post_ra>
// kernel: tpu_custom_call.1
= control target key start
LH: loop header
LB: loop body
LE: loop exit
PB: predicated region body
PF: predicated region fallthrough
CT: control target
= control target key end

     0   :  { %10 = vsyncpa [#allocation3], 0  ;;  %s348_s0 = inlined_call_operand.hbm [shape: f32[16,128], index: 0, kind: input, shape index: {}]   ;;  %s349_s1 = inlined_call_operand.hbm [shape: f32[128,128], index: 1, kind: input, shape index: {}]   ;;  %s350_s2 = inlined_call_operand.vmem [shape: f32[1,128], index: 2, kind: input, shape index: {}]   ;;  %s351_s3 = inlined_call_operand.hbm [shape: f32[16,128], index: 3, kind: output, shape index: {0}]   ;;  %s352_s4 = inlined_call_operand.hbm [shape: f32[1,2,128], index: 4, kind: output, shape index: {1}]  }
   0x1   :  { %11 = vsyncpa [#allocation6], 0 }
   0x2   :  { %12 = vsyncpa [#allocation4], 0 }
   0x3   :  { %13 = vsyncpa [#allocation9], 0  ;;  %s18_s17 = sshll.u32 %s348_s0, 4  ;;  %s293_s18 = smov [#allocation2]   ;;  %s19_s17 = int_to_ptr.hbm [resolvable:$true] %s18_s17 }
   0x4   :  { %s20_s19 = sshll.u32 %s293_s18, 4  ;;  %s31_s22 = sshll.u32 %s349_s1, 4  ;;  %s21_s19 = int_to_ptr.vmem [resolvable:$true] %s20_s19  ;;  %s32_s22 = int_to_ptr.hbm [resolvable:$true] %s31_s22 }
   0x5   :  { %s294_s23 = smov 128   ;;  %s295_s24 = smov 8  }
   0x6   :  { %26 = dma.hbm_to_vmem [thread:$0]  %s19_s17, 256, %s21_s19, [#allocation3], %s294_s23, %s294_s23, %s295_s24  }
   0x7   :  { %s296_s25 = smov [#allocation5]  }
   0x8   :  { %s33_s26 = sshll.u32 %s296_s25, 4  ;;  %s34_s26 = int_to_ptr.vmem [resolvable:$true] %s33_s26 }
   0x9   :  { %39 = dma.hbm_to_vmem [thread:$0]  %s32_s22, 2048, %s34_s26, [#allocation6], %s294_s23, %s294_s23, %s295_s24  }
   0xa   :  { %285 = dma.done.wait [#allocation3], 256  }
   0xb   :  { %286 = vsyncadd [#allocation3], 4294967040 }
   0xc   :  { %287 = dma.done.wait [#allocation6], 2048  }
   0xd   :  { %288 = vsyncadd [#allocation6], 4294965248  ;;  %v67_v0 = vld [vmem:[#allocation5 + $0x78] sm:$0xff]  ;;  %v66_v1 = vld [vmem:[#allocation5 + $0x70] sm:$0xff]  ;;  %s297_s27 = smov [#allocation7]   ;;  %s136_s5 = sshll.u32 %s351_s3, 4  ;;  %s137_s5 = int_to_ptr.hbm [resolvable:$true] %s136_s5 }
   0xe   :  { %72 = vmatpush.msra.mxu0 %v67_v0  ;;  %166 = vmatpush.msra.mxu1 %v67_v0  ;;  %v65_v2 = vld [vmem:[#allocation5 + $0x68] sm:$0xff]  ;;  %v64_v3 = vld [vmem:[#allocation5 + $0x60] sm:$0xff]  ;;  %v63_v4 = vld [vmem:[#allocation5 + $0x58] sm:$0xff]  ;;  %s134_s28 = sshll.u32 %s297_s27, 4  ;;  %s150_s8 = sshll.u32 %s352_s4, 4  ;;  %s135_s28 = int_to_ptr.vmem [resolvable:$true] %s134_s28  ;;  %s151_s8 = int_to_ptr.hbm [resolvable:$true] %s150_s8 }
   0xf   :  { %v62_v5 = vld [vmem:[#allocation5 + $0x50] sm:$0xff]  ;;  %v61_v6 = vld [vmem:[#allocation5 + $0x48] sm:$0xff]  ;;  %v60_v7 = vld [vmem:[#allocation5 + $0x40] sm:$0xff] }
  0x10   :  { %73 = vmatpush.msra.mxu0 %v66_v1  ;;  %167 = vmatpush.msra.mxu1 %v66_v1  ;;  %v59_v8 = vld [vmem:[#allocation5 + $0x38] sm:$0xff]  ;;  %v58_v9 = vld [vmem:[#allocation5 + $0x30] sm:$0xff]  ;;  %v57_v10 = vld [vmem:[#allocation5 + $0x28] sm:$0xff] }
  0x11   :  { %v56_v11 = vld [vmem:[#allocation5 + $0x20] sm:$0xff]  ;;  %v55_v12 = vld [vmem:[#allocation5 + $0x18] sm:$0xff]  ;;  %v54_v13 = vld [vmem:[#allocation5 + $0x10] sm:$0xff] }
  0x12   :  { %74 = vmatpush.msra.mxu0 %v65_v2  ;;  %168 = vmatpush.msra.mxu1 %v65_v2  ;;  %v53_v14 = vld [vmem:[#allocation5 + $0x8] sm:$0xff]  ;;  %v52_v15 = vld [vmem:[#allocation5] sm:$0xff]  ;;  %v50_v16 = vld [vmem:[#allocation2] sm:$0xff] }
  0x13   :  { %v51_v17 = vld [vmem:[#allocation2 + $0x8] sm:$0xff]  ;;  %v188_v18 = vld [vmem:[%s350_s2] ss:$0 sm:$0xff]  ;;  %s298_s2 = smov [#allocation8]  }
  0x14   :  { %75 = vmatpush.msra.mxu0 %v64_v3  ;;  %169 = vmatpush.msra.mxu1 %v64_v3  ;;  %s148_s3 = sshll.u32 %s298_s2, 4  ;;  %s149_s3 = int_to_ptr.vmem [resolvable:$true] %s148_s3 }
  0x16   :  { %76 = vmatpush.msra.mxu0 %v63_v4  ;;  %170 = vmatpush.msra.mxu1 %v63_v4 }
  0x18   :  { %77 = vmatpush.msra.mxu0 %v62_v5  ;;  %171 = vmatpush.msra.mxu1 %v62_v5 }
  0x1a   :  { %78 = vmatpush.msra.mxu0 %v61_v6  ;;  %172 = vmatpush.msra.mxu1 %v61_v6 }
  0x1c   :  { %79 = vmatpush.msra.mxu0 %v60_v7  ;;  %173 = vmatpush.msra.mxu1 %v60_v7 }
  0x1e   :  { %80 = vmatpush.msra.mxu0 %v59_v8  ;;  %174 = vmatpush.msra.mxu1 %v59_v8 }
  0x20   :  { %81 = vmatpush.msra.mxu0 %v58_v9  ;;  %175 = vmatpush.msra.mxu1 %v58_v9 }
  0x22   :  { %82 = vmatpush.msra.mxu0 %v57_v10  ;;  %176 = vmatpush.msra.mxu1 %v57_v10 }
  0x24   :  { %83 = vmatpush.msra.mxu0 %v56_v11  ;;  %177 = vmatpush.msra.mxu1 %v56_v11 }
  0x26   :  { %84 = vmatpush.msra.mxu0 %v55_v12  ;;  %178 = vmatpush.msra.mxu1 %v55_v12 }
  0x28   :  { %85 = vmatpush.msra.mxu0 %v54_v13  ;;  %179 = vmatpush.msra.mxu1 %v54_v13 }
  0x2a   :  { %86 = vmatpush.msra.mxu0 %v53_v14  ;;  %180 = vmatpush.msra.mxu1 %v53_v14 }
  0x2c   :  { %87 = vmatpush.msra.mxu0 %v52_v15  ;;  %181 = vmatpush.msra.mxu1 %v52_v15 }
  0x2d   :  { %88 = vmatmul.f32.vlgmr.msra.gmra.mxu0 %v50_v16  ;;  %91 = vmatmul.f32.vlgmr.msra.gmra.mxu1 %v51_v17 }
  0xaa   :  { %v89_v19 = vpop.f32.mrf.mxu0  ;;  %v92_v20 = vpop.f32.mrf.mxu1 }
  0xab   :  { %v90_v21 = vadd.f32 %v188_v18, %v89_v19  ;;  %v93_v22 = vadd.f32 %v188_v18, %v92_v20 }
  0xad   :  { %v113_v23 = vrot.slane %v90_v21, 4  ;;  %v120_v24 = vmul.f32 %v90_v21, %v90_v21  ;;  %95 = vst [vmem:[#allocation7] sm:$0xff] %v90_v21 }
  0xae   :  { %96 = vst [vmem:[#allocation7 + $0x8] sm:$0xff] %v93_v22 }
  0xaf   :  { %v114_v25 = vadd.f32 %v113_v23, %v90_v21  ;;  %v123_v26 = vrot.slane %v120_v24, 4  ;;  %142 = dma.vmem_to_hbm [thread:$0]  %s135_s28, 256, %s137_s5, [#allocation4], %s294_s23, %s294_s23, %s295_s24  }
  0xb1   :  { %v115_v27 = vrot.slane %v114_v25, 2  ;;  %v124_v28 = vadd.f32 %v123_v26, %v120_v24 }
  0xb3   :  { %v116_v29 = vadd.f32 %v115_v27, %v114_v25  ;;  %v125_v30 = vrot.slane %v124_v28, 2 }
  0xb5   :  { %v117_v31 = vrot.slane %v116_v29, 1  ;;  %v126_v32 = vadd.f32 %v125_v30, %v124_v28 }
  0xb7   :  { %v118_v33 = vadd.f32 %v117_v31, %v116_v29  ;;  %v127_v34 = vrot.slane %v126_v32, 1 }
  0xb9   :  { %119 = vst [vmem:[#allocation8] sm:$0x1] %v118_v33  ;;  %v128_v35 = vadd.f32 %v127_v34, %v126_v32 }
  0xbb   :  { %129 = vst [vmem:[#allocation8 + $0x1] sm:$0x1] %v128_v35 }
  0xbc   :  { %153 = dma.vmem_to_hbm [thread:$0]  %s149_s3, 32, %s151_s8, [#allocation9]  }
  0xbd   :  { %289 = dma.done.wait [#allocation4], 256  }
  0xbe   :  { %290 = vsyncadd [#allocation4], 4294967040 }
  0xbf   :  { %291 = dma.done.wait [#allocation9], 32  }
  0xc0   :  { %292 = vsyncadd [#allocation9], 4294967264 }
  0xc1   :  { %162 = vsyncpa [#allocation3], 1 }
  0xc2   :  { %163 = vsyncpa [#allocation6], 1 }
  0xc3   :  { %164 = vsyncpa [#allocation4], 1 }
  0xc4   :  { %165 = vsyncpa [#allocation9], 1 }

</bundles_post_ra>
